<compile_context>
chip_gen: v6e
topology: v6e:2x2x1
jax: 0.10.0
libtpu: 0.0.40
codegen_flags: <defaults>
</compile_context>

<pallas_src>
import jax
import jax.numpy as jnp
from jax.experimental import pallas as pl
from jax.experimental.pallas import tpu as pltpu

EPS = 1e-10


def _l2norm_kernel(x_ref, w_ref, o_ref):
    # x_ref / o_ref: (1, C, T) tile — spatial positions on lanes, channels on
    # sublanes. w_ref: (1, C, 1) per-channel scale (constant index_map, so the
    # pipeline keeps it resident — no per-step re-DMA).
    x = x_ref[...].astype(jnp.float32)
    w = w_ref[...].astype(jnp.float32)
    sq_sum = jnp.sum(x * x, axis=1, keepdims=True)            # (1, 1, T)
    inv_norm = pl.reciprocal(jnp.sqrt(sq_sum) + EPS, approx=False)
    o_ref[...] = (x * inv_norm * w).astype(o_ref.dtype)


def _pick_spatial_tile(C, HW, itemsize, target_bytes=2 << 20):
    """Lane-axis tile size: ~target_bytes of input per grid step, multiple of
    128 (or the full spatial extent if that's smaller). ~2 MiB/block keeps the
    double-buffered in+out footprint (~4x block) under v5e's 16 MiB scoped
    default while sitting past the measured roofline knee on v6e/v7x."""
    t = target_bytes // max(1, C * itemsize)
    t = max(128, (t // 128) * 128)
    if t >= HW:
        return HW  # full extent is always a legal block dim
    return t


def l2norm(x_nchw, weight, t_hw=None):
    """x_nchw: (N, C, H, W); weight: (C,). Returns (N, C, H, W)."""
    N, C, H, W = x_nchw.shape
    HW = H * W
    x3 = x_nchw.reshape(N, C, HW)          # free view — no transpose / pad
    if t_hw is None:
        t_hw = _pick_spatial_tile(C, HW, x3.dtype.itemsize)
    w3 = weight.reshape(1, C, 1)

    out3 = pl.pallas_call(
        _l2norm_kernel,
        out_shape=jax.ShapeDtypeStruct((N, C, HW), x_nchw.dtype),
        grid=(N, pl.cdiv(HW, t_hw)),
        in_specs=[
            pl.BlockSpec((1, C, t_hw), lambda n, h: (n, 0, h)),
            pl.BlockSpec((1, C, 1), lambda n, h: (0, 0, 0)),
        ],
        out_specs=pl.BlockSpec((1, C, t_hw), lambda n, h: (n, 0, h)),
        compiler_params=pltpu.CompilerParams(
            dimension_semantics=("parallel", "parallel"),
            vmem_limit_bytes=64 << 20,
        ),
    )(x3, w3)
    return out3.reshape(N, C, H, W)


def l2norm_ref(x_nchw, weight):
    # Pure-JAX reference matching the PyTorch forward exactly.
    norm = jnp.sqrt(jnp.sum(x_nchw**2, axis=1, keepdims=True)) + EPS
    return weight[None, :, None, None] * (x_nchw / norm)


if __name__ == "__main__":
    key = jax.random.PRNGKey(0)
    N, C, H, W = 2, 4, 16, 16
    scale = 20.0  # gamma; PyTorch init.constant_(weight, scale)

    x = jax.random.normal(key, (N, C, H, W), dtype=jnp.float32)
    weight = jnp.full((C,), scale, dtype=jnp.float32)

    out = l2norm(x, weight)
    jax.block_until_ready(out)

    ref = l2norm_ref(x, weight)
    assert out.shape == (N, C, H, W)
    assert jnp.allclose(out, ref, atol=1e-5, rtol=1e-5)

    print("KERNEL_OK")
</pallas_src>

<mosaic_0001>
module attributes {stable_mosaic.version = 11 : i64} {
  func.func @_l2norm_kernel(%arg0: i32, %arg1: i32, %arg2: memref<1x4x256xf32, #tpu.memory_space<vmem>>, %arg3: memref<1x4x1xf32, #tpu.memory_space<vmem>>, %arg4: memref<1x4x256xf32, #tpu.memory_space<vmem>>) attributes {dimension_semantics = [#tpu.dimension_semantics<parallel>, #tpu.dimension_semantics<parallel>], iteration_bounds = array<i64: 2, 1>, scalar_prefetch = 0 : i64, scratch_operands = 0 : i64, tpu.core_type = #tpu.core_type<tc>, window_params = [{transform_indices = @transform_0, window_bounds = array<i64: 1, 4, 256>}, {pipeline_mode = #tpu.pipeline_mode<synchronous>, transform_indices = @transform_1, window_bounds = array<i64: 1, 4, 1>}, {transform_indices = @transform_2, window_bounds = array<i64: 1, 4, 256>}]} {
    %c0 = arith.constant 0 : index
    %c0_0 = arith.constant 0 : index
    %c0_1 = arith.constant 0 : index
    %0 = vector.load %arg2[%c0, %c0_0, %c0_1] : memref<1x4x256xf32, #tpu.memory_space<vmem>>, vector<1x4x256xf32>
    %c0_2 = arith.constant 0 : index
    %c0_3 = arith.constant 0 : index
    %c0_4 = arith.constant 0 : index
    %1 = vector.load %arg3[%c0_2, %c0_3, %c0_4] : memref<1x4x1xf32, #tpu.memory_space<vmem>>, vector<1x4x1xf32>
    %2 = arith.mulf %0, %0 : vector<1x4x256xf32>
    %cst = arith.constant dense<0.000000e+00> : vector<1x256xf32>
    %3 = vector.multi_reduction <add>, %2, %cst [1] : vector<1x4x256xf32> to vector<1x256xf32>
    %4 = vector.shape_cast %3 : vector<1x256xf32> to vector<1x1x256xf32>
    %5 = math.sqrt %4 : vector<1x1x256xf32>
    %cst_5 = arith.constant 1.000000e-10 : f32
    %6 = vector.broadcast %cst_5 : f32 to vector<1x1x256xf32>
    %7 = arith.addf %5, %6 : vector<1x1x256xf32>
    %8 = tpu.reciprocal %7 : vector<1x1x256xf32> -> vector<1x1x256xf32>
    %9 = vector.broadcast %8 : vector<1x1x256xf32> to vector<1x4x256xf32>
    %10 = arith.mulf %0, %9 : vector<1x4x256xf32>
    %11 = vector.broadcast %1 : vector<1x4x1xf32> to vector<1x4x256xf32>
    %12 = arith.mulf %10, %11 : vector<1x4x256xf32>
    %c0_6 = arith.constant 0 : index
    %c0_7 = arith.constant 0 : index
    %c0_8 = arith.constant 0 : index
    %13 = vector.load %arg4[%c0_6, %c0_7, %c0_8] : memref<1x4x256xf32, #tpu.memory_space<vmem>>, vector<1x4x256xf32>
    tpu.vector_store %arg4[%c0_6, %c0_7, %c0_8], %12 {strides = array<i32>} : memref<1x4x256xf32, #tpu.memory_space<vmem>>, vector<1x4x256xf32>,
    return
  }
  func.func @transform_0(%arg0: i32, %arg1: i32) -> (i32, i32, i32) {
    %c0_i32 = arith.constant 0 : i32
    %c0_i32_0 = arith.constant 0 : i32
    return %arg0, %c0_i32, %arg1 : i32, i32, i32
  }
  func.func @transform_1(%arg0: i32, %arg1: i32) -> (i32, i32, i32) {
    %c0_i32 = arith.constant 0 : i32
    %c0_i32_0 = arith.constant 0 : i32
    %c0_i32_1 = arith.constant 0 : i32
    %c0_i32_2 = arith.constant 0 : i32
    return %c0_i32, %c0_i32_0, %c0_i32_1 : i32, i32, i32
  }
  func.func @transform_2(%arg0: i32, %arg1: i32) -> (i32, i32, i32) {
    %c0_i32 = arith.constant 0 : i32
    %c0_i32_0 = arith.constant 0 : i32
    return %arg0, %c0_i32, %arg1 : i32, i32, i32
  }
}

</mosaic_0001>

<bundles_post_ra>
// kernel: tpu_custom_call.1
= control target key start
LH: loop header
LB: loop body
LE: loop exit
PB: predicated region body
PF: predicated region fallthrough
CT: control target
= control target key end

     0   :  { %7 = vsyncpa [#allocation3], 0  ;;  %s699_s0 = inlined_call_operand.hbm [shape: f32[2,4,256], index: 0, kind: input, shape index: {}]   ;;  %s700_s1 = inlined_call_operand.vmem [shape: f32[1,4,1], index: 1, kind: input, shape index: {}]   ;;  %s701_s2 = inlined_call_operand.hbm [shape: f32[2,4,256], index: 2, kind: output, shape index: {}]  }
   0x1   :  { %9 = vsyncpa [#allocation3 + $0x1], 0 }
   0x2   :  { %10 = vsyncpa [#allocation4], 0 }
   0x3   :  { %12 = vsyncpa [#allocation4 + $0x1], 0  ;;  %s558_s9 = smov 0   ;;  %s560_s10 = smov 0  }
   0x4   :  { %s562_s11 = smov 0   ;;  %s564_s12 = smov 0  }
   0x5   :  { %s566_s13 = smov 0   ;;  %s568_s14 = smov 0  }
   0x6 LB: > { %s339_s15 = sadd.s32 4294967295, %s537_s14   ;;  %s340_s16 = sadd.s32 4294967294, %s537_s14   ;;  %s537_s14 = sphi %s568_s14, %s18_s14   ;;  %s533_s13 = sphi %s566_s13, %s713_s13   ;;  %s529_s12 = sphi %s564_s12, %s712_s12   ;;  %s525_s11 = sphi %s562_s11, %s711_s11   ;;  %s521_s10 = sphi %s560_s10, %s710_s10   ;;  %s517_s9 = sphi %s558_s9, %s709_s9  }
   0x7   : > { %s30_s17 = sadd.s32 1, %s533_s13  ;;  %s39_s18 = sadd.s32 1, %s525_s11 }
   0x8   : > { %p32_p0 = scmp.ge.s32.totalorder %s30_s17, 2  ;;  %p46_p1 = scmp.ne.s32.totalorder %s525_s11, %s521_s10 }
   0x9   : > { %p47_p2 = scmp.eq.s32.totalorder %s537_s14, 0  ;;  %p52_p3 = scmp.ne.s32.totalorder %s521_s10, %s517_s9 }
   0xa   : > { %s715_s17 = smov (%p32_p0, %s30_s17), 0  ;;  %p53_p5 = scmp.eq.s32.totalorder %s339_s15, 0 }
   0xb   : > { %p599_p4 = por %p47_p2, %p46_p1  ;;  %s34_s20 = ssub.s32 %s533_s13, %s715_s17 }
   0xc   : > { %p99_p6 = scmp.eq.s32.totalorder %s339_s15, 1  ;;  %p37_p7 = scmp.eq.s32.totalorder %s34_s20, 0 }
   0xd   : > { %p605_p8 = por %p53_p5, %p52_p3  ;;  %p105_p10 = scmp.eq.s32.totalorder %s340_s16, 1 }
   0xe   : > { %p609_p9 = por %p99_p6, %p46_p1  ;;  %p368_p13 = scmp.lt.s32.totalorder %s537_s14, 2 }
   0xf   : > { %s614_s23 = scalar_select %p37_p7, %s525_s11, %s39_s18  }
  0x10   : > { %p616_p11 = por %p105_p10, %p52_p3  ;;  %s128_s25 = sand.u32 1, %s525_s11  }
  0x11   : > { %s343_s26 = sshll.u32 %s128_s25, 3  ;;  %s354_s27 = sshll.u32 %s533_s13, 7 }
  0x12   : > { %s705_s24 = scalar_select %p616_p11, 1, 0 }
  0x13   : > { %s140_s30 = scalar_lea.hbm %s699_s0, %s354_s27  ;;  %s132_s3 = scalar_lea.vmem [#allocation2], %s343_s26 }
  0x14   : > { %s142_s4 = sshll.u32 %s132_s3, 4  ;;  %p629_p0 = pnand %p368_p13, %p599_p4  ;;  %s143_s4 = int_to_ptr.vmem [resolvable:$true] %s142_s4 }
  0x15   : > { %p346_p1 = scmp.ge.s32.totalorder %s537_s14, 1  ;;  %p147_p2 = scmp.lt.s32.totalorder %s537_s14, 3 }
  0x16   : > { %s129_s6 = scalar_lea.sflag [#allocation3], %s128_s25  ;;  %p431_p3 = pneg %p629_p0 }
  0x17   : > { %s442_s7 = scalar_lea.vmem %s143_s4, 128  ;;  %s539_s8 = smov [#allocation2]  }
  0x18   : > { %p443_p5 = scmp.ne.s32.totalorder %s143_s4, %s442_s7  ;;  %s447_s15 = sshll.u32 %s539_s8, 4  ;;  %s448_s15 = int_to_ptr.vmem [resolvable:$false] %s447_s15 }
  0x19   : > { %s449_s16 = scalar_lea.vmem %s448_s15, 256  ;;  %p450_p10 = scmp.lt.s32.totalorder %s143_s4, %s448_s15 }
  0x1a   : > { %p445_p6 = pnand %p443_p5, %p431_p3  ;;  %p451_p12 = scmp.lt.s32.totalorder %s449_s16, %s442_s7 }
  0x1c   : > { %p446_p7 = pneg %p445_p6  ;;  %p452_p4 = por %p451_p12, %p450_p10 }
  0x1e   : > { %p453_p13 = pnand %p452_p4, %p446_p7 }
  0x20   : > { %456 = shalt.err (!%p453_p13)
}
  0x21   : > { %363 = dma.hbm_to_vmem [thread:$0]  (!%p629_p0), %s140_s30, 128, %s143_s4, %s129_s6  }
  0x22   : > { %p148_p11 = pnand %p346_p1, %p147_p2 }
  0x23   : > { %s644_s18 = sand.u32 (!%p148_p11), 1, %s521_s10  }
  0x24   : > { %151 = sbr.rel (%p148_p11) target bundleno = 185 (0xb9), region = 28  ;;  %s347_s19 = sshll.u32 (!%p148_p11), %s644_s18, 3 }
  0x25   : > { %s154_s20 = scalar_lea.sflag (!%p148_p11), [#allocation3], %s644_s18  ;;  %s157_s25 = scalar_lea.vmem (!%p148_p11), [#allocation2], %s347_s19 }
  0x29   : > { %508 = dma.done.wait (%p605_p8), %s154_s20, 128  }
  0x2a   : > { %510 = vsyncadd (%p605_p8), %s154_s20, 4294967168  ;;  %v540_v0 = vmov 0   ;;  %v181_v1 = vld [vmem:[%s700_s1] sm:$0xf]  ;;  %vm186_vm0 = vcmask 1043456   ;;  %v231_v33 = vlaneseq  ;;  %s355_s21 = sshll.u32 %s529_s12, 7 }
  0x2b   : > { %420 = vset.pattern.permute.xlu0 %v540_v0  ;;  %v180_v2 = vld [vmem:[%s157_s25] sm:$0xff]  ;;  %v541_v31 = vmov 839922192   ;;  %s177_s28 = scalar_lea.vmem [#allocation5], %s347_s19  ;;  %s253_s4 = scalar_lea.hbm %s701_s2, %s355_s21 }
  0x2c   : > { %226 = vperm.xlu0 %420, %v181_v1   ;;  %v182_v3 = vmul.f32 %v180_v2, %v180_v2  ;;  %v229_v32 = vunpack.c.l.s4 %v541_v31  ;;  %v232_v37 = vshrl.u32 %v231_v33, 7  ;;  %s255_s29 = sshll.u32 %s177_s28, 4  ;;  %s239_s5 = scalar_lea.sflag [#allocation4], %s644_s18  ;;  %s256_s29 = int_to_ptr.vmem [resolvable:$true] %s255_s29 }
  0x2d   : > { %s457_s6 = scalar_lea.vmem %s256_s29, 128  ;;  %s542_s7 = smov [#allocation5]  }
  0x2e   : > { %v184_v4 = vcombine.high %v182_v3, %v182_v3  ;;  %v187_v5 = vsel %vm186_vm0, %v182_v3, 0.0  ;;  %v230_v36 = vunpack.c.0.s8 %v229_v32  ;;  %p458_p8 = scmp.ne.s32.totalorder %s256_s29, %s457_s6  ;;  %s461_s8 = sshll.u32 %s542_s7, 4  ;;  %s462_s8 = int_to_ptr.vmem [resolvable:$false] %s461_s8 }
  0x2f   : > { %v188_v7 = vrot.slane %v187_v5, 4  ;;  %s463_s12 = scalar_lea.vmem %s462_s8, 256  ;;  %p464_p0 = scmp.lt.s32.totalorder %s256_s29, %s462_s8 }
  0x30   : > { %v194_v6 = vsel %vm186_vm0, %v184_v4, 0.0  ;;  %v233_v39 = vsub.s32 %v230_v36, %v232_v37  ;;  %p459_p11 = pnand %p458_p8, %p609_p9  ;;  %p465_p1 = scmp.lt.s32.totalorder %s463_s12, %s457_s6 }
  0x31   : > { %v195_v8 = vrot.slane %v194_v6, 4  ;;  %v189_v9 = vadd.f32 %v188_v7, %v187_v5 }
  0x32   : > { %p460_p12 = pneg %p459_p11  ;;  %p466_p2 = por %p465_p1, %p464_p0 }
  0x33   : > { %v196_v10 = vadd.f32 %v195_v8, %v194_v6  ;;  %v190_v11 = vrot.slane %v189_v9, 2 }
  0x34   : > { %p467_p3 = pnand %p466_p2, %p460_p12 }
  0x35   : > { %v197_v12 = vrot.slane %v196_v10, 2  ;;  %v191_v13 = vadd.f32 %v190_v11, %v189_v9 }
  0x37   : > { %v198_v14 = vadd.f32 %v197_v12, %v196_v10  ;;  %v192_v15 = vrot.slane %v191_v13, 1 }
  0x39   : > { %v199_v16 = vrot.slane %v198_v14, 1  ;;  %v193_v17 = vadd.f32 %v192_v15, %v191_v13 }
  0x3b   : > { %v200_v18 = vadd.f32 %v199_v16, %v198_v14  ;;  %421 = vrsqrt.f32 %v193_v17  ;;  %vm203_vm1 = vcmp.eq.f32.partialorder %v193_v17, inf  ;;  %v206_v23 = vand.u32 2147483648, %v193_v17 }
  0x3c   : > { %vm205_vm3 = vcmp.eq.f32.partialorder %v193_v17, 0.0 }
  0x3d   : > { %423 = vrsqrt.f32 %v200_v18  ;;  %vm210_vm2 = vcmp.eq.f32.partialorder %v200_v18, inf  ;;  %v213_v25 = vand.u32 2147483648, %v200_v18  ;;  %vm212_vm4 = vcmp.eq.f32.partialorder %v200_v18, 0.0 }
  0x48   : > { %v422_v19 = vpop.eup %421 }
  0x49   : > { %v202_v21 = vmul.f32 %v422_v19, %v193_v17 }
  0x4a   : > { %v424_v20 = vpop.eup %423 }
  0x4b   : > { %v209_v22 = vmul.f32 %v424_v20, %v200_v18  ;;  %v204_v24 = vsel %vm203_vm1, %v193_v17, %v202_v21 }
  0x4c   : > { %v207_v27 = vsel %vm205_vm3, %v206_v23, %v204_v24 }
  0x4d   : > { %v211_v26 = vsel %vm210_vm2, %v200_v18, %v209_v22  ;;  %v215_v29 = vadd.f32 1e-10, %v207_v27 }
  0x4e   : > { %v214_v28 = vsel %vm212_vm4, %v213_v25, %v211_v26 }
  0x4f   : > { %v216_v30 = vadd.f32 1e-10, %v214_v28  ;;  %425 = vrcp.f32 %v215_v29 }
  0x51   : > { %427 = vrcp.f32 %v216_v30 }
  0x5c   : > { %v426_v34 = vpop.eup %425 }
  0x5e   : > { %v428_v35 = vpop.eup %427 }
  0x5f   : > { %v221_v38 = vcombine.low %v426_v34, %v428_v35 }
  0x61   : > { %v223_v40 = vmul.f32 %v221_v38, %v180_v2 }
  0xa7   : > { %v227_v41 = vpop.permute.xlu0 %226 }
  0xa8   : > { %v234_v42 = vrot.slane %v227_v41, %v233_v39 }
  0xaa   : > { %v236_v43 = vmul.f32 %v234_v42, %v223_v40 }
  0xac   : > { %237 = vst [vmem:[%s177_s28] sm:$0xff] %v236_v43 }
  0xad   : > { %470 = shalt.err (!%p467_p3)
}
  0xae   : > { %s471_s15 = scalar_lea.hbm %s253_s4, 128  ;;  %s475_s19 = scalar_lea.hbm %s701_s2, 256 }
  0xaf   : > { %p472_p5 = scmp.ne.s32.totalorder %s253_s4, %s471_s15  ;;  %p476_p10 = scmp.lt.s32.totalorder %s253_s4, %s701_s2 }
  0xb0   : > { %p477_p4 = scmp.lt.s32.totalorder %s475_s19, %s471_s15 }
  0xb1   : > { %p473_p6 = pnand %p472_p5, %p609_p9 }
  0xb2   : > { %p478_p13 = por %p477_p4, %p476_p10 }
  0xb3   : > { %p474_p7 = pneg %p473_p6 }
  0xb5   : > { %p479_p8 = pnand %p478_p13, %p474_p7 }
  0xb7   : > { %482 = shalt.err (!%p479_p8)
}
  0xb8   : > { %358 = dma.vmem_to_hbm [thread:$0]  (%p609_p9), %s256_s29, 128, %s253_s4, %s239_s5  }
  0xb9 PF: > { %s267_s26 = sand.u32 1, %s517_s9   ;;  %p707_p11 = scmp.ne.s32.totalorder %s705_s24, 0 }
  0xba   : > { %p708_p12 = scmp.ge.s32.totalorder %s537_s14, 2  ;;  %s268_s27 = scalar_lea.sflag [#allocation4], %s267_s26 }
  0xbc   : > { %p365_p0 = pnand %p708_p12, %p707_p11 }
  0xbe   : > { %p366_p1 = pneg %p365_p0 }
  0xc0   : > { %512 = dma.done.wait (%p366_p1), %s268_s27, 128  }
  0xc1   : > { %514 = vsyncadd (%p366_p1), %s268_s27, 4294967168  ;;  %s18_s14 = sadd.s32 1, %s537_s14   ;;  %s709_s9 = smov %s521_s10 }
  0xc2   : > { %p15_p2 = scmp.ge.s32.totalorder %s18_s14, 4   ;;  %s710_s10 = smov %s525_s11 }
  0xc3   : > { %s711_s11 = smov %s614_s23  ;;  %s712_s12 = smov %s533_s13 }
  0xc4   : > { %s713_s13 = smov %s715_s17  ;;  %17 = sbr.rel (!%p15_p2) target bundleno = 6 (0x6), region = 73 }
  0xc9   :  { %273 = vsyncpa [#allocation3], 1 }
  0xca   :  { %275 = vsyncpa [#allocation3 + $0x1], 1 }
  0xcb   :  { %276 = vsyncpa [#allocation4], 1 }
  0xcc   :  { %278 = vsyncpa [#allocation4 + $0x1], 1 }

</bundles_post_ra>
